<compile_context>
chip_gen: v6e
topology: v6e:2x2x1
jax: 0.10.0
libtpu: 0.0.40
codegen_flags: <defaults>
</compile_context>

<pallas_src>
import jax
import jax.numpy as jnp
from jax.experimental import pallas as pl
from jax.experimental.pallas import tpu as pltpu


def _tpu_defaults():
    """Generation-dependent tile sizes and VMEM limit (v5e/v6e: 128 MiB, v7x: 64 MiB)."""
    vmem_bytes = 64 * 1024 * 1024
    try:
        info = pltpu.get_tpu_info()
        vmem_bytes = int(getattr(info, "vmem_capacity_bytes", vmem_bytes))
    except Exception:
        pass
    if vmem_bytes >= 100 * 1024 * 1024:
        # v5e / v6e (128 MiB physical VMEM): large q_tile cuts K/V re-streaming.
        return {"q_tile": 512, "kv_tile": 256, "vmem_limit": 100 * 1024 * 1024}
    # v7x (64 MiB physical VMEM): leave headroom for compiler scratch / spills.
    return {"q_tile": 256, "kv_tile": 256, "vmem_limit": 48 * 1024 * 1024}


def _qkv_proj_kernel(x_ref, wqkv_ref, q_ref, k_ref, v_ref):
    """One (row_tile, D) x-tile -> (row_tile, dh) q/k/v tiles for head program_id(2).

    A single (row_tile, D) @ (D, 3*dh) matmul (fused q|k|v weight, resident in VMEM)
    replaces the three per-head N=dh matmuls of the previous version.
    """
    h = pl.program_id(2)
    dh = q_ref.shape[-1]
    x = x_ref[...].astype(jnp.bfloat16)                          # (row_tile, D)
    w = wqkv_ref[h]                                              # (D, 3*dh) bf16
    res = jnp.dot(x, w, preferred_element_type=jnp.float32)      # (row_tile, 3*dh)
    q_ref[...] = res[:, :dh].astype(q_ref.dtype)
    k_ref[...] = res[:, dh:2 * dh].astype(k_ref.dtype)
    v_ref[...] = res[:, 2 * dh:].astype(v_ref.dtype)


def _flash_attn_kernel(q_ref, k_ref, v_ref, wo_ref, bo_ref, o_ref,
                       m_sc, l_sc, acc_sc):
    """Online-softmax flash attention over kv tiles + fused to_out epilogue.

    The softmax scale is already folded into wq, so no per-step scaling here.
    """
    kv = pl.program_id(2)

    @pl.when(kv == 0)
    def _():
        m_sc[...] = jnp.full_like(m_sc, -jnp.inf)
        l_sc[...] = jnp.zeros_like(l_sc)
        acc_sc[...] = jnp.zeros_like(acc_sc)

    q = q_ref[...]                                               # (H, q_tile, dh) bf16
    k = k_ref[...]                                               # (H, kv_tile, dh) bf16
    v = v_ref[...]                                               # (H, kv_tile, dh) bf16

    # Head-batched QK^T on the MXU, statistics in f32.
    s = jnp.einsum("hqd,hkd->hqk", q, k,
                   preferred_element_type=jnp.float32)           # (H, q_tile, kv_tile)

    m_prev = m_sc[...]
    m_new = jnp.maximum(m_prev, jnp.max(s, axis=-1, keepdims=True))
    alpha = jnp.exp(m_prev - m_new)
    p = jnp.exp(s - m_new)
    l_sc[...] = alpha * l_sc[...] + jnp.sum(p, axis=-1, keepdims=True)
    acc_sc[...] = alpha * acc_sc[...] + jnp.einsum(
        "hqk,hkd->hqd", p.astype(jnp.bfloat16), v,
        preferred_element_type=jnp.float32)                      # (H, q_tile, dh)
    m_sc[...] = m_new

    @pl.when(kv == pl.num_programs(2) - 1)
    def _():
        inv_l = pl.reciprocal(l_sc[...], approx=True)            # EUP, ~free
        o_h = (acc_sc[...] * inv_l).astype(jnp.bfloat16)         # (H, q_tile, dh)
        # Fused to_out: per-head projection (wo head-split to (H, dh, D)), then a
        # reduction over heads -- avoids any in-kernel transpose / lane reshape.
        prj = jnp.einsum("hqd,hde->hqe", o_h, wo_ref[...],
                         preferred_element_type=jnp.float32)     # (H, q_tile, D)
        o_ref[...] = (jnp.sum(prj, axis=0) + bo_ref[...]).astype(o_ref.dtype)


def memory_efficient_cross_attention(x, params, *, heads, dim_head,
                                     row_tile=None, q_tile=None, kv_tile=None):
    """x: [B, N, D] float32.  params: dict of weights (see _init_params)."""
    B, N, D = x.shape
    bf16 = jnp.bfloat16

    defaults = _tpu_defaults()
    row_tile = min(row_tile if row_tile is not None else 256, N)
    q_tile = min(q_tile if q_tile is not None else defaults["q_tile"], N)
    kv_tile = min(kv_tile if kv_tile is not None else defaults["kv_tile"], N)
    assert N % row_tile == 0 and N % q_tile == 0 and N % kv_tile == 0, (
        "sequence length must be divisible by the chosen tile sizes")

    # One-time weight prep in plain XLA (outside the kernels):
    #  * softmax scale folded into wq (f32, before the bf16 cast) -> exact, free.
    #  * q/k/v weights fused per head into (heads, D, 3*dh), bf16.
    scale = float(dim_head) ** -0.5
    wq_h = (params["wq"] * scale).reshape(D, heads, dim_head)
    wk_h = params["wk"].reshape(D, heads, dim_head)
    wv_h = params["wv"].reshape(D, heads, dim_head)
    wqkv = jnp.transpose(jnp.stack([wq_h, wk_h, wv_h], axis=2), (1, 0, 2, 3))
    wqkv = wqkv.reshape(heads, D, 3 * dim_head).astype(bf16)      # (H, D, 3*dh)
    wo_h = params["wo"].reshape(heads, dim_head, D).astype(bf16)  # (H, dh, D)
    bo = params["bo"].reshape(1, D).astype(jnp.float32)

    vmem_limit = defaults["vmem_limit"]
    cparams_qkv = pltpu.CompilerParams(
        dimension_semantics=("parallel", "parallel", "parallel"),
        vmem_limit_bytes=vmem_limit)
    cparams_attn = pltpu.CompilerParams(
        dimension_semantics=("parallel", "parallel", "arbitrary"),
        vmem_limit_bytes=vmem_limit)

    # ---- kernel 1: fused QKV projection into head-major bf16 buffers --------
    q, k, v = pl.pallas_call(
        _qkv_proj_kernel,
        out_shape=(
            jax.ShapeDtypeStruct((B, heads, N, dim_head), bf16),
            jax.ShapeDtypeStruct((B, heads, N, dim_head), bf16),
            jax.ShapeDtypeStruct((B, heads, N, dim_head), bf16),
        ),
        grid_spec=pltpu.PrefetchScalarGridSpec(
            num_scalar_prefetch=0,
            grid=(B, N // row_tile, heads),
            in_specs=[
                pl.BlockSpec((None, row_tile, D), lambda b, i, h: (b, i, 0)),
                # Fused q|k|v weight: VMEM-resident across the whole grid.
                pl.BlockSpec((heads, D, 3 * dim_head), lambda b, i, h: (0, 0, 0),
                             pipeline_mode=pl.Buffered(1)),
            ],
            out_specs=[
                pl.BlockSpec((None, None, row_tile, dim_head),
                             lambda b, i, h: (b, h, i, 0)),
            ] * 3,
        ),
        compiler_params=cparams_qkv,
    )(x, wqkv)

    # ---- kernel 2: flash attention + fused output projection ---------------
    out = pl.pallas_call(
        _flash_attn_kernel,
        out_shape=jax.ShapeDtypeStruct((B, N, D), x.dtype),
        grid_spec=pltpu.PrefetchScalarGridSpec(
            num_scalar_prefetch=0,
            grid=(B, N // q_tile, N // kv_tile),
            in_specs=[
                pl.BlockSpec((None, heads, q_tile, dim_head),
                             lambda b, i, j: (b, 0, i, 0)),
                pl.BlockSpec((None, heads, kv_tile, dim_head),
                             lambda b, i, j: (b, 0, j, 0)),
                pl.BlockSpec((None, heads, kv_tile, dim_head),
                             lambda b, i, j: (b, 0, j, 0)),
                # Constant weights: single-buffered, resident across the whole grid.
                pl.BlockSpec((heads, dim_head, D), lambda b, i, j: (0, 0, 0),
                             pipeline_mode=pl.Buffered(1)),
                pl.BlockSpec((1, D), lambda b, i, j: (0, 0),
                             pipeline_mode=pl.Buffered(1)),
            ],
            out_specs=pl.BlockSpec((None, q_tile, D), lambda b, i, j: (b, i, 0)),
            scratch_shapes=[
                pltpu.VMEM((heads, q_tile, 1), jnp.float32),          # running max
                pltpu.VMEM((heads, q_tile, 1), jnp.float32),          # running sum
                pltpu.VMEM((heads, q_tile, dim_head), jnp.float32),   # accumulator
            ],
        ),
        compiler_params=cparams_attn,
    )(q, k, v, wo_h, bo)
    return out


def _init_params(key, dim, heads, dim_head):
    inner = heads * dim_head
    keys = jax.random.split(key, 5)
    s = 0.02
    return {
        # to_q / to_k / to_v: Linear(dim, inner, bias=False), stored (in, out)
        "wq": s * jax.random.normal(keys[0], (dim, inner), jnp.float32),
        "wk": s * jax.random.normal(keys[1], (dim, inner), jnp.float32),
        "wv": s * jax.random.normal(keys[2], (dim, inner), jnp.float32),
        # to_out[0]: Linear(inner, dim) with bias (Dropout(p=0) is identity in eval)
        "wo": s * jax.random.normal(keys[3], (inner, dim), jnp.float32),
        "bo": s * jax.random.normal(keys[4], (dim,), jnp.float32),
    }


def _reference(x, p, heads, dim_head):
    """Plain-JAX reference for the default self-attention path."""
    B, N, D = x.shape
    q = x @ p["wq"]
    k = x @ p["wk"]
    v = x @ p["wv"]

    def split(t):
        return t.reshape(B, N, heads, dim_head).transpose(0, 2, 1, 3)

    qh, kh, vh = split(q), split(k), split(v)
    s = jnp.einsum("bhnd,bhmd->bhnm", qh, kh) * (dim_head ** -0.5)
    a = jax.nn.softmax(s, axis=-1)
    o = jnp.einsum("bhnm,bhmd->bhnd", a, vh)
    o = o.transpose(0, 2, 1, 3).reshape(B, N, heads * dim_head)
    return o @ p["wo"] + p["bo"]


if __name__ == "__main__":
    # Small but tiling-exercising config: multiple row / q / kv tiles per batch.
    B, N, D = 2, 512, 128
    heads, dim_head = 2, 64

    key = jax.random.PRNGKey(0)
    kx, kp = jax.random.split(key)
    x = jax.random.normal(kx, (B, N, D), jnp.float32)
    params = _init_params(kp, D, heads, dim_head)

    out = memory_efficient_cross_attention(x, params, heads=heads, dim_head=dim_head)
    out = jax.block_until_ready(out)

    ref = _reference(x, params, heads, dim_head)
    assert out.shape == (B, N, D)
    max_err = float(jnp.max(jnp.abs(out - ref)))
    # Kernel uses bf16 MXU operands (f32 accumulation/statistics) -> bf16-level tolerance.
    assert jnp.allclose(out, ref, atol=2e-3, rtol=2e-2), f"mismatch vs reference: {max_err}"

    print("KERNEL_OK")
</pallas_src>

<mosaic_0001>
module attributes {stable_mosaic.version = 11 : i64} {
  func.func @_qkv_proj_kernel(%arg0: i32, %arg1: i32, %arg2: i32, %arg3: memref<1x256x128xf32, #tpu.memory_space<vmem>>, %arg4: memref<2x128x192xbf16, #tpu.memory_space<vmem>>, %arg5: memref<1x1x256x64xbf16, #tpu.memory_space<vmem>>, %arg6: memref<1x1x256x64xbf16, #tpu.memory_space<vmem>>, %arg7: memref<1x1x256x64xbf16, #tpu.memory_space<vmem>>) attributes {dimension_semantics = [#tpu.dimension_semantics<parallel>, #tpu.dimension_semantics<parallel>, #tpu.dimension_semantics<parallel>], iteration_bounds = array<i64: 2, 2, 2>, scalar_prefetch = 0 : i64, scratch_operands = 0 : i64, tpu.core_type = #tpu.core_type<tc>, window_params = [{transform_indices = @transform_0, window_bounds = array<i64: 1, 256, 128>}, {pipeline_mode = #tpu.pipeline_mode<synchronous>, transform_indices = @transform_1, window_bounds = array<i64: 2, 128, 192>}, {transform_indices = @transform_2, window_bounds = array<i64: 1, 1, 256, 64>}, {transform_indices = @transform_3, window_bounds = array<i64: 1, 1, 256, 64>}, {transform_indices = @transform_4, window_bounds = array<i64: 1, 1, 256, 64>}]} {
    %c0 = arith.constant 0 : index
    %c0_0 = arith.constant 0 : index
    %c0_1 = arith.constant 0 : index
    %0 = vector.load %arg3[%c0, %c0_0, %c0_1] : memref<1x256x128xf32, #tpu.memory_space<vmem>>, vector<1x256x128xf32>
    %1 = vector.shape_cast %0 : vector<1x256x128xf32> to vector<256x128xf32>
    %2 = arith.truncf %1 : vector<256x128xf32> to vector<256x128xbf16>
    %3 = arith.index_cast %arg2 : i32 to index
    %c0_2 = arith.constant 0 : index
    %c0_3 = arith.constant 0 : index
    %4 = vector.load %arg4[%3, %c0_2, %c0_3] : memref<2x128x192xbf16, #tpu.memory_space<vmem>>, vector<1x128x192xbf16>
    %5 = vector.shape_cast %4 : vector<1x128x192xbf16> to vector<128x192xbf16>
    %cst = arith.constant dense<0.000000e+00> : vector<256x192xf32>
    %6 = tpu.matmul %2, %5, %cst {dimension_numbers = #tpu.dot_dimension_numbers<[1], [0], [0], [1], [0, 0, 1, 1], [], []>} : vector<256x128xbf16>, vector<128x192xbf16>, vector<256x192xf32> -> vector<256x192xf32>
    %7 = vector.extract_strided_slice %6 {offsets = [0, 0], sizes = [256, 64], strides = [1, 1]} : vector<256x192xf32> to vector<256x64xf32>
    %8 = arith.truncf %7 : vector<256x64xf32> to vector<256x64xbf16>
    %c0_4 = arith.constant 0 : index
    %c0_5 = arith.constant 0 : index
    %c0_6 = arith.constant 0 : index
    %c0_7 = arith.constant 0 : index
    %9 = vector.load %arg5[%c0_4, %c0_5, %c0_6, %c0_7] : memref<1x1x256x64xbf16, #tpu.memory_space<vmem>>, vector<1x1x256x64xbf16>
    %10 = vector.shape_cast %9 : vector<1x1x256x64xbf16> to vector<256x64xbf16>
    %11 = vector.shape_cast %8 : vector<256x64xbf16> to vector<1x1x256x64xbf16>
    tpu.vector_store %arg5[%c0_4, %c0_5, %c0_6, %c0_7], %11 {strides = array<i32>} : memref<1x1x256x64xbf16, #tpu.memory_space<vmem>>, vector<1x1x256x64xbf16>,
    %12 = vector.extract_strided_slice %6 {offsets = [0, 64], sizes = [256, 64], strides = [1, 1]} : vector<256x192xf32> to vector<256x64xf32>
    %13 = arith.truncf %12 : vector<256x64xf32> to vector<256x64xbf16>
    %c0_8 = arith.constant 0 : index
    %c0_9 = arith.constant 0 : index
    %c0_10 = arith.constant 0 : index
    %c0_11 = arith.constant 0 : index
    %14 = vector.load %arg6[%c0_8, %c0_9, %c0_10, %c0_11] : memref<1x1x256x64xbf16, #tpu.memory_space<vmem>>, vector<1x1x256x64xbf16>
    %15 = vector.shape_cast %14 : vector<1x1x256x64xbf16> to vector<256x64xbf16>
    %16 = vector.shape_cast %13 : vector<256x64xbf16> to vector<1x1x256x64xbf16>
    tpu.vector_store %arg6[%c0_8, %c0_9, %c0_10, %c0_11], %16 {strides = array<i32>} : memref<1x1x256x64xbf16, #tpu.memory_space<vmem>>, vector<1x1x256x64xbf16>,
    %17 = vector.extract_strided_slice %6 {offsets = [0, 128], sizes = [256, 64], strides = [1, 1]} : vector<256x192xf32> to vector<256x64xf32>
    %18 = arith.truncf %17 : vector<256x64xf32> to vector<256x64xbf16>
    %c0_12 = arith.constant 0 : index
    %c0_13 = arith.constant 0 : index
    %c0_14 = arith.constant 0 : index
    %c0_15 = arith.constant 0 : index
    %19 = vector.load %arg7[%c0_12, %c0_13, %c0_14, %c0_15] : memref<1x1x256x64xbf16, #tpu.memory_space<vmem>>, vector<1x1x256x64xbf16>
    %20 = vector.shape_cast %19 : vector<1x1x256x64xbf16> to vector<256x64xbf16>
    %21 = vector.shape_cast %18 : vector<256x64xbf16> to vector<1x1x256x64xbf16>
    tpu.vector_store %arg7[%c0_12, %c0_13, %c0_14, %c0_15], %21 {strides = array<i32>} : memref<1x1x256x64xbf16, #tpu.memory_space<vmem>>, vector<1x1x256x64xbf16>,
    return
  }
  func.func @transform_0(%arg0: i32, %arg1: i32, %arg2: i32) -> (i32, i32, i32) {
    %c0_i32 = arith.constant 0 : i32
    %c0_i32_0 = arith.constant 0 : i32
    return %arg0, %arg1, %c0_i32 : i32, i32, i32
  }
  func.func @transform_1(%arg0: i32, %arg1: i32, %arg2: i32) -> (i32, i32, i32) {
    %c0_i32 = arith.constant 0 : i32
    %c0_i32_0 = arith.constant 0 : i32
    %c0_i32_1 = arith.constant 0 : i32
    %c0_i32_2 = arith.constant 0 : i32
    return %c0_i32, %c0_i32_0, %c0_i32_1 : i32, i32, i32
  }
  func.func @transform_2(%arg0: i32, %arg1: i32, %arg2: i32) -> (i32, i32, i32, i32) {
    %c0_i32 = arith.constant 0 : i32
    %c0_i32_0 = arith.constant 0 : i32
    return %arg0, %arg2, %arg1, %c0_i32 : i32, i32, i32, i32
  }
  func.func @transform_3(%arg0: i32, %arg1: i32, %arg2: i32) -> (i32, i32, i32, i32) {
    %c0_i32 = arith.constant 0 : i32
    %c0_i32_0 = arith.constant 0 : i32
    return %arg0, %arg2, %arg1, %c0_i32 : i32, i32, i32, i32
  }
  func.func @transform_4(%arg0: i32, %arg1: i32, %arg2: i32) -> (i32, i32, i32, i32) {
    %c0_i32 = arith.constant 0 : i32
    %c0_i32_0 = arith.constant 0 : i32
    return %arg0, %arg2, %arg1, %c0_i32 : i32, i32, i32, i32
  }
}

</mosaic_0001>

<bundles_post_ra>
// kernel: tpu_custom_call.1
= control target key start
LH: loop header
LB: loop body
LE: loop exit
PB: predicated region body
PF: predicated region fallthrough
CT: control target
= control target key end

     0   :  { %s2277_s0 = inlined_call_operand.hbm [shape: f32[2,512,128], index: 0, kind: input, shape index: {}]   ;;  %s2278_s1 = inlined_call_operand.vmem [shape: bf16[2,128,192], index: 1, kind: input, shape index: {}]   ;;  %s2279_s2 = inlined_call_operand.vmem [shape: bf16[2,2,512,64], index: 2, kind: output, shape index: {0}]   ;;  %s2280_s3 = inlined_call_operand.vmem [shape: bf16[2,2,512,64], index: 3, kind: output, shape index: {1}]   ;;  %s2281_s4 = inlined_call_operand.vmem [shape: bf16[2,2,512,64], index: 4, kind: output, shape index: {2}]  }
   0x1   :  { %2284 = sst [smem:[#allocation8_spill]] %s2280_s3 }
   0x2   :  { %2285 = sst [smem:[#allocation9_spill]] %s2281_s4 }
   0x3   :  { %10 = vsyncpa [#allocation3], 0 }
   0x4   :  { %12 = vsyncpa [#allocation3 + $0x1], 0  ;;  %s1818_s15 = smov 0   ;;  %s1820_s16 = smov 0  }
   0x5   :  { %s1822_s17 = smov 0   ;;  %s1824_s18 = smov 0  }
   0x6   :  { %s1826_s19 = smov 0   ;;  %s1828_s20 = smov 0  }
   0x7   :  { %s1830_s21 = smov 0   ;;  %s1832_s22 = smov 0  }
   0x8   :  { %s1834_s23 = smov 0   ;;  %s1836_s24 = smov 0  }
   0x9 LB: > { %2286 = sst [smem:[#allocation5_spill]] %s1774_s21  ;;  %s1374_s25 = sadd.s32 4294967295, %s1786_s24   ;;  %s1786_s24 = sphi %s1836_s24, %s18_s24   ;;  %s1782_s23 = sphi %s1834_s23, %s2303_s23   ;;  %s1778_s22 = sphi %s1832_s22, %s2302_s22   ;;  %s1774_s21 = sphi %s1830_s21, %s2295_s21   ;;  %s1770_s20 = sphi %s1828_s20, %s2301_s20   ;;  %s1766_s19 = sphi %s1826_s19, %s2300_s19   ;;  %s1762_s18 = sphi %s1824_s18, %s2294_s18   ;;  %s1758_s17 = sphi %s1822_s17, %s2299_s17   ;;  %s1754_s16 = sphi %s1820_s16, %s2298_s16   ;;  %s1750_s15 = sphi %s1818_s15, %s2297_s15  }
   0xa   : > { %s30_s26 = sadd.s32 1, %s1774_s21  ;;  %s33_s27 = sadd.s32 1, %s1778_s22 }
   0xb   : > { %p31_p0 = scmp.ge.s32.totalorder %s30_s26, 2  ;;  %s37_s28 = sadd.s32 1, %s1782_s23 }
   0xc   : > { %s46_s29 = sadd.s32 1, %s1758_s17  ;;  %p53_p1 = scmp.ne.s32.totalorder %s1758_s17, %s1754_s16 }
   0xd   : > { %s2305_s26 = smov (%p31_p0, %s30_s26), 0  ;;  %s2307_s27 = smov (!%p31_p0, %s33_s27), %s1778_s22 }
   0xe   : > { %2287 = sst [smem:[#allocation6_spill]] %s2305_s26  ;;  %p54_p2 = scmp.eq.s32.totalorder %s1786_s24, 0 }
   0xf   : > { %p35_p3 = scmp.ge.s32.totalorder %s2307_s27, 2  ;;  %p59_p4 = scmp.ne.s32.totalorder %s1754_s16, %s1750_s15 }
  0x10   : > { %p1878_p5 = por %p54_p2, %p53_p1  ;;  %p60_p6 = scmp.eq.s32.totalorder %s1374_s25, 0 }
  0x11   : > { %s2309_s27 = smov (%p35_p3, %s2307_s27), 0  ;;  %s2311_s28 = smov (!%p35_p3, %s37_s28), %s1782_s23 }
  0x12   : > { %2289 = sst [smem:[#allocation7_spill]] %s2309_s27  ;;  %s42_s5 = ssub.s32 %s1778_s22, %s2309_s27 }
  0x13   : > { %p1887_p7 = por %p60_p6, %p59_p4  ;;  %p39_p8 = scmp.ge.s32.totalorder %s2311_s28, 2 }
  0x14   : > { %p1567_p9 = scmp.lt.s32.totalorder %s1786_s24, 8  ;;  %s197_s7 = sand.u32 1, %s1758_s17  }
  0x15   : > { %s2313_s28 = smov (%p39_p8, %s2311_s28), 0  ;;  %s1378_s8 = sshll.u32 %s197_s7, 8 }
  0x16   : > { %s41_s9 = ssub.s32 %s1782_s23, %s2313_s28  ;;  %s1379_s11 = sshll.u32 %s1778_s22, 5 }
  0x17   : > { %s43_s10 = sor.u32 %s42_s5, %s41_s9  ;;  %s1380_s12 = sshll.u32 %s1782_s23, 6 }
  0x18   : > { %p44_p10 = scmp.eq.s32.totalorder %s43_s10, 0  ;;  %s207_s13 = sadd.s32 %s1380_s12, %s1379_s11 }
  0x19   : > { %s201_s14 = scalar_lea.vmem [#allocation2], %s1378_s8  ;;  %s1381_s27 = sshll.u32 %s207_s13, 7 }
  0x1a   : > { %s210_s15 = sshll.u32 %s201_s14, 4  ;;  %s209_s3 = scalar_lea.hbm %s2277_s0, %s1381_s27  ;;  %s211_s15 = int_to_ptr.vmem [resolvable:$true] %s210_s15 }
  0x1b   : > { %s1900_s25 = scalar_select %p44_p10, %s1758_s17, %s46_s29  }
  0x1c   : > { %p1909_p11 = pnand %p1567_p9, %p1878_p5  ;;  %p1382_p12 = scmp.ge.s32.totalorder %s1786_s24, 1 }
  0x1d   : > { %s198_s5 = scalar_lea.sflag [#allocation3], %s197_s7  ;;  %s1689_s8 = scalar_lea.vmem %s211_s15, 4096 }
  0x1e   : > { %p1678_p13 = pneg %p1909_p11  ;;  %p1690_p0 = scmp.ne.s32.totalorder %s211_s15, %s1689_s8 }
  0x1f   : > { %s1788_s29 = smov [#allocation2]  }
  0x20   : > { %p1692_p1 = pnand %p1690_p0, %p1678_p13  ;;  %s1694_s9 = sshll.u32 %s1788_s29, 4  ;;  %s1695_s9 = int_to_ptr.vmem [resolvable:$false] %s1694_s9 }
  0x21   : > { %s1696_s21 = scalar_lea.vmem %s1695_s9, 8192  ;;  %p1697_p3 = scmp.lt.s32.totalorder %s211_s15, %s1695_s9 }
  0x22   : > { %p1693_p2 = pneg %p1692_p1  ;;  %p1698_p4 = scmp.lt.s32.totalorder %s1696_s21, %s1689_s8 }
  0x24   : > { %p1699_p6 = por %p1698_p4, %p1697_p3 }
  0x26   : > { %p1700_p5 = pnand %p1699_p6, %p1693_p2 }
  0x28   : > { %1703 = shalt.err (!%p1700_p5)
}
  0x29   : > { %s1789_s26 = smov 128   ;;  %s1790_s27 = smov 8  }
  0x2a   : > { %1566 = dma.hbm_to_vmem [thread:$0]  (!%p1909_p11), %s209_s3, 4096, %s211_s15, %s198_s5, %s1789_s26, %s1789_s26, %s1790_s27  }
  0x2b   : > { %p218_p8 = scmp.lt.s32.totalorder %s1786_s24, 9 }
  0x2d   : > { %p219_p9 = pnand %p1382_p12, %p218_p8 }
  0x2e   : > { %s224_s30 = sand.u32 (!%p219_p9), 1, %s1754_s16  }
  0x2f   : > { %222 = sbr.rel (%p219_p9) target bundleno = 463 (0x1cf), region = 28  ;;  %s1383_s7 = sshll.u32 (!%p219_p9), %s224_s30, 8 }
  0x30   : > { %s225_s10 = scalar_lea.sflag (!%p219_p9), [#allocation3], %s224_s30  ;;  %s1922_s11 = scalar_lea.vmem (!%p219_p9), [#allocation2], %s1383_s7 }
  0x34   : > { %1745 = dma.done.wait (%p1887_p7), %s225_s10, 4096  }
  0x35   : > { %1747 = vsyncadd (%p1887_p7), %s225_s10, 4294963200  ;;  %s1480_s12 = sshll.u32 %s1762_s18, 7  ;;  %v1791_v0 = vmov 0   ;;  %v331_v17 = vld [vmem:[%s1922_s11] sm:$0xff]  ;;  %v332_v18 = vld [vmem:[%s1922_s11 + $0x8] sm:$0xff]  ;;  %s1384_s6 = sshll.u32 %s1766_s19, 5 }
  0x36   : > { %510 = vmatprep.mubr.bf16.mxu0 %v1791_v0  ;;  %590 = vmatprep.mubr.bf16.mxu1 %v1791_v0  ;;  %s1934_s13 = scalar_lea.vmem %s2278_s1, %s1480_s12  ;;  %v347_v19 = vld [vmem:[%s1922_s11 + $0x80] sm:$0xff]  ;;  %v348_v20 = vld [vmem:[%s1922_s11 + $0x88] sm:$0xff]  ;;  %v363_v21 = vpack.c.bf16 %v332_v18, %v331_v17  ;;  %v333_v23 = vld [vmem:[%s1922_s11 + $0x10] sm:$0xff]  ;;  %p291_p7 = scmp.lt.s32.totalorder %s1762_s18, 1  ;;  %vm799_vm0 = vcmask 519168  }
  0x37   : > { %v1652_v1 = vld [vmem:[%s1934_s13 + $0x74] ss:$8 sps:$4 sm:$0xff]   ;;  %v1654_v2 = vld [vmem:[%s1934_s13 + $0x70] ss:$8 sps:$4 sm:$0xff]   ;;  %v1655_v3 = vld [vmem:[%s1934_s13 + $0x64] ss:$8 sps:$4 sm:$0xff]   ;;  %v371_v22 = vpack.c.bf16 %v348_v20, %v347_v19 }
  0x38   : > { %478 = vmatprep.subr.bf16.mxu0 %v1652_v1  ;;  %1545 = vmatprep.subr.bf16.mxu1 %v1652_v1  ;;  %v1657_v4 = vld [vmem:[%s1934_s13 + $0x60] ss:$8 sps:$4 sm:$0xff]   ;;  %v1658_v5 = vld [vmem:[%s1934_s13 + $0x54] ss:$8 sps:$4 sm:$0xff]   ;;  %v1660_v6 = vld [vmem:[%s1934_s13 + $0x50] ss:$8 sps:$4 sm:$0xff]  }
  0x39   : > { %479 = vmatpush1.bf16.msra.mxu0 %v1654_v2  ;;  %1553 = vmatpush1.bf16.msra.mxu1 %v1654_v2  ;;  %v1661_v7 = vld [vmem:[%s1934_s13 + $0x44] ss:$8 sps:$4 sm:$0xff]   ;;  %v1663_v8 = vld [vmem:[%s1934_s13 + $0x40] ss:$8 sps:$4 sm:$0xff]   ;;  %v1664_v9 = vld [vmem:[%s1934_s13 + $0x34] ss:$8 sps:$4 sm:$0xff]  }
  0x3a   : > { %480 = vmatprep.subr.bf16.mxu0 %v1655_v3  ;;  %1546 = vmatprep.subr.bf16.mxu1 %v1655_v3  ;;  %v1666_v10 = vld [vmem:[%s1934_s13 + $0x30] ss:$8 sps:$4 sm:$0xff]   ;;  %v1667_v11 = vld [vmem:[%s1934_s13 + $0x24] ss:$8 sps:$4 sm:$0xff]   ;;  %v1669_v12 = vld [vmem:[%s1934_s13 + $0x20] ss:$8 sps:$4 sm:$0xff]  }
  0x3b   : > { %v1670_v13 = vld [vmem:[%s1934_s13 + $0x14] ss:$8 sps:$4 sm:$0xff]   ;;  %v1672_v14 = vld [vmem:[%s1934_s13 + $0x10] ss:$8 sps:$4 sm:$0xff]   ;;  %v1673_v15 = vld [vmem:[%s1934_s13 + $0x4] ss:$8 sps:$4 sm:$0xff]  }
  0x3c   : > { %v1675_v16 = vld [vmem:[%s1934_s13] ss:$8 sps:$4 sm:$0xff]   ;;  %v334_v24 = vld [vmem:[%s1922_s11 + $0x18] sm:$0xff]  ;;  %v349_v25 = vld [vmem:[%s1922_s11 + $0x90] sm:$0xff]  ;;  %p289_p10 = scmp.lt.s32.totalorder %s1770_s20, 1  ;;  %p293_p11 = scmp.lt.s32.totalorder %s1384_s6, 63 }
  0x3d   : > { %481 = vmatpush1.bf16.msra.mxu0 %v1657_v4  ;;  %1554 = vmatpush1.bf16.msra.mxu1 %v1657_v4  ;;  %v350_v26 = vld [vmem:[%s1922_s11 + $0x98] sm:$0xff]  ;;  %v364_v27 = vpack.c.bf16 %v334_v24, %v333_v23  ;;  %v335_v29 = vld [vmem:[%s1922_s11 + $0x20] sm:$0xff]  ;;  %v336_v30 = vld [vmem:[%s1922_s11 + $0x28] sm:$0xff]  ;;  %s2315_s18 = smov (!%p291_p7, %s1762_s18), 1  ;;  %s1792_s30 = smov 64  }
  0x3e   : > { %482 = vmatprep.subr.bf16.mxu0 %v1658_v5  ;;  %1547 = vmatprep.subr.bf16.mxu1 %v1658_v5  ;;  %v372_v28 = vpack.c.bf16 %v350_v26, %v349_v25  ;;  %v351_v31 = vld [vmem:[%s1922_s11 + $0xa0] sm:$0xff]  ;;  %v352_v32 = vld [vmem:[%s1922_s11 + $0xa8] sm:$0xff]  ;;  %v365_v33 = vpack.c.bf16 %v336_v30, %v335_v29  ;;  %v337_v35 = vld [vmem:[%s1922_s11 + $0x30] sm:$0xff]  ;;  %s2317_s20 = smov (!%p289_p10, %s1770_s20), 1  ;;  %s2319_s6 = smov (!%p293_p11, %s1384_s6), 63 }
  0x3f   : > { %v373_v34 = vpack.c.bf16 %v352_v32, %v351_v31  ;;  %v338_v36 = vld [vmem:[%s1922_s11 + $0x38] sm:$0xff]  ;;  %v353_v37 = vld [vmem:[%s1922_s11 + $0xb0] sm:$0xff]  ;;  %v339_v41 = vld [vmem:[%s1922_s11 + $0x40] sm:$0xff]  ;;  %s1385_s14 = sshll.u32 %s2315_s18, 6  ;;  %s1386_s5 = sshll.u32 %s2317_s20, 7 }
  0x40   : > { %v354_v38 = vld [vmem:[%s1922_s11 + $0xb8] sm:$0xff]  ;;  %v366_v39 = vpack.c.bf16 %v338_v36, %v337_v35  ;;  %v340_v42 = vld [vmem:[%s1922_s11 + $0x48] sm:$0xff]  ;;  %v355_v43 = vld [vmem:[%s1922_s11 + $0xc0] sm:$0xff]  ;;  %s296_s15 = sadd.s32 %s1385_s14, %s2319_s6  ;;  %s2292_s20 = sld [smem:[#allocation9_spill]] }
  0x41   : > { %483 = vmatpush1.bf16.msra.mxu0 %v1660_v6  ;;  %1555 = vmatpush1.bf16.msra.mxu1 %v1660_v6  ;;  %v374_v40 = vpack.c.bf16 %v354_v38, %v353_v37  ;;  %v356_v44 = vld [vmem:[%s1922_s11 + $0xc8] sm:$0xff]  ;;  %v367_v45 = vpack.c.bf16 %v340_v42, %v339_v41  ;;  %v341_v47 = vld [vmem:[%s1922_s11 + $0x50] sm:$0xff]  ;;  %v342_v48 = vld [vmem:[%s1922_s11 + $0x58] sm:$0xff]  ;;  %s298_s8 = sadd.s32 %s1386_s5, %s296_s15 }
  0x42   : > { %484 = vmatprep.subr.bf16.mxu0 %v1661_v7  ;;  %1548 = vmatprep.subr.bf16.mxu1 %v1661_v7  ;;  %v375_v46 = vpack.c.bf16 %v356_v44, %v355_v43  ;;  %v357_v49 = vld [vmem:[%s1922_s11 + $0xd0] sm:$0xff]  ;;  %v358_v50 = vld [vmem:[%s1922_s11 + $0xd8] sm:$0xff]  ;;  %v368_v51 = vpack.c.bf16 %v342_v48, %v341_v47  ;;  %v343_v53 = vld [vmem:[%s1922_s11 + $0x60] sm:$0xff]  ;;  %s2003_s29 = sshll.u32 %s298_s8, 2 }
  0x43   : > { %v376_v52 = vpack.c.bf16 %v358_v50, %v357_v49  ;;  %v344_v54 = vld [vmem:[%s1922_s11 + $0x68] sm:$0xff]  ;;  %v359_v55 = vld [vmem:[%s1922_s11 + $0xe0] sm:$0xff]  ;;  %v345_v59 = vld [vmem:[%s1922_s11 + $0x70] sm:$0xff]  ;;  %s2009_s26 = scalar_lea.vmem %s2279_s2, %s2003_s29 }
  0x44   : > { %v360_v56 = vld [vmem:[%s1922_s11 + $0xe8] sm:$0xff]  ;;  %v369_v57 = vpack.c.bf16 %v344_v54, %v343_v53  ;;  %v346_v60 = vld [vmem:[%s1922_s11 + $0x78] sm:$0xff]  ;;  %v361_v61 = vld [vmem:[%s1922_s11 + $0xf0] sm:$0xff] }
  0x45   : > { %485 = vmatpush1.bf16.msra.mxu0 %v1663_v8  ;;  %1556 = vmatpush1.bf16.msra.mxu1 %v1663_v8  ;;  %v377_v58 = vpack.c.bf16 %v360_v56, %v359_v55  ;;  %v362_v62 = vld [vmem:[%s1922_s11 + $0xf8] sm:$0xff]  ;;  %v370_v63 = vpack.c.bf16 %v346_v60, %v345_v59  ;;  %s2293_s11 = sld [smem:[#allocation8_spill]] }
  0x46   : > { %486 = vmatprep.subr.bf16.mxu0 %v1664_v9  ;;  %1549 = vmatprep.subr.bf16.mxu1 %v1664_v9  ;;  %v378_v1 = vpack.c.bf16 %v362_v62, %v361_v61  ;;  %s2015_s27 = scalar_lea.vmem %s2292_s20, %s2003_s29 }
  0x49   : > { %487 = vmatpush1.bf16.msra.mxu0 %v1666_v10  ;;  %1557 = vmatpush1.bf16.msra.mxu1 %v1666_v10 }
  0x4a   : > { %488 = vmatprep.subr.bf16.mxu0 %v1667_v11  ;;  %1550 = vmatprep.subr.bf16.mxu1 %v1667_v11 }
  0x4b   : > { %s2181_s12 = scalar_lea.vmem %s2293_s11, %s2003_s29 }
  0x4d   : > { %489 = vmatpush1.bf16.msra.mxu0 %v1669_v12  ;;  %1558 = vmatpush1.bf16.msra.mxu1 %v1669_v12 }
  0x4e   : > { %490 = vmatprep.subr.bf16.mxu0 %v1670_v13  ;;  %1551 = vmatprep.subr.bf16.mxu1 %v1670_v13 }
  0x51   : > { %491 = vmatpush1.bf16.msra.mxu0 %v1672_v14  ;;  %1559 = vmatpush1.bf16.msra.mxu1 %v1672_v14 }
  0x52   : > { %492 = vmatprep.subr.bf16.mxu0 %v1673_v15  ;;  %1552 = vmatprep.subr.bf16.mxu1 %v1673_v15 }
  0x55   : > { %493 = vmatpush1.bf16.msra.mxu0 %v1675_v16  ;;  %1560 = vmatpush1.bf16.msra.mxu1 %v1675_v16 }
  0x58   : > { %511 = vmatmul.mubr.bf16.vlgmr.msra.gmra.mxu0 %v363_v21  ;;  %591 = vmatmul.mubr.bf16.vlgmr.msra.gmra.mxu1 %v371_v22 }
  0x59   : > { %520 = vmatprep.mubr.bf16.mxu0 %v1791_v0  ;;  %600 = vmatprep.mubr.bf16.mxu1 %v1791_v0 }
  0x60   : > { %521 = vmatmul.mubr.bf16.gmra.mxu0 %v364_v27  ;;  %601 = vmatmul.mubr.bf16.gmra.mxu1 %v372_v28 }
  0x61   : > { %530 = vmatprep.mubr.bf16.mxu0 %v1791_v0  ;;  %610 = vmatprep.mubr.bf16.mxu1 %v1791_v0 }
  0x68   : > { %531 = vmatmul.mubr.bf16.gmra.mxu0 %v365_v33  ;;  %611 = vmatmul.mubr.bf16.gmra.mxu1 %v373_v34 }
  0x69   : > { %540 = vmatprep.mubr.bf16.mxu0 %v1791_v0  ;;  %620 = vmatprep.mubr.bf16.mxu1 %v1791_v0 }
  0x70   : > { %541 = vmatmul.mubr.bf16.gmra.mxu0 %v366_v39  ;;  %621 = vmatmul.mubr.bf16.gmra.mxu1 %v374_v40 }
  0x71   : > { %550 = vmatprep.mubr.bf16.mxu0 %v1791_v0  ;;  %630 = vmatprep.mubr.bf16.mxu1 %v1791_v0 }
  0x78   : > { %551 = vmatmul.mubr.bf16.gmra.mxu0 %v367_v45  ;;  %631 = vmatmul.mubr.bf16.gmra.mxu1 %v375_v46 }
  0x79   : > { %560 = vmatprep.mubr.bf16.mxu0 %v1791_v0  ;;  %640 = vmatprep.mubr.bf16.mxu1 %v1791_v0 }
  0x80   : > { %561 = vmatmul.mubr.bf16.gmra.mxu0 %v368_v51  ;;  %641 = vmatmul.mubr.bf16.gmra.mxu1 %v376_v52 }
  0x81   : > { %570 = vmatprep.mubr.bf16.mxu0 %v1791_v0  ;;  %650 = vmatprep.mubr.bf16.mxu1 %v1791_v0 }
  0x88   : > { %571 = vmatmul.mubr.bf16.gmra.mxu0 %v369_v57  ;;  %651 = vmatmul.mubr.bf16.gmra.mxu1 %v377_v58 }
  0x89   : > { %580 = vmatprep.mubr.bf16.mxu0 %v1791_v0  ;;  %660 = vmatprep.mubr.bf16.mxu1 %v1791_v0 }
  0x90   : > { %581 = vmatmul.mubr.bf16.gmra.mxu0 %v370_v63  ;;  %661 = vmatmul.mubr.bf16.gmra.mxu1 %v378_v1 }
 0x118   : > { %v512_v0 = vpop.f32.mrf.mxu0  ;;  %v592_v2 = vpop.f32.mrf.mxu1 }
 0x119   : > { %v1481_v3 = vpack.c.bf16 %v512_v0, %v512_v0  ;;  %v1497_v4 = vpack.c.bf16 %v592_v2, %v592_v2 }
 0x11a   : > { %v514_v5 = vpop.f32.mrf.mxu0  ;;  %v594_v6 = vpop.f32.mrf.mxu1 }
 0x11b   : > { %800 = vst.msk [vmem:[%s2009_s26] sm:$0xf] %vm799_vm0, %v1481_v3  ;;  %816 = vst.msk [vmem:[%s2009_s26 + $0x40] sm:$0xf] %vm799_vm0, %v1497_v4  ;;  %v1513_v7 = vpack.c.bf16 %v514_v5, %v514_v5  ;;  %v1529_v8 = vpack.c.bf16 %v594_v6, %v594_v6  ;;  %832 = vrot.lane.b32.xlu0 %v1481_v3, %s1792_s30 }
 0x11c   : > { %v516_v9 = vpop.f32.mrf.mxu0  ;;  %v596_v10 = vpop.f32.mrf.mxu1 }
 0x11d   : > { %1088 = vst.msk [vmem:[%s2015_s27] sm:$0xf] %vm799_vm0, %v1513_v7  ;;  %1104 = vst.msk [vmem:[%s2015_s27 + $0x40] sm:$0xf] %vm799_vm0, %v1529_v8  ;;  %v1482_v11 = vpack.c.bf16 %v516_v9, %v516_v9  ;;  %v1498_v12 = vpack.c.bf16 %v596_v10, %v596_v10 }
 0x11e   : > { %v518_v13 = vpop.f32.mrf.mxu0  ;;  %v598_v14 = vpop.f32.mrf.mxu1 }
 0x11f   : > { %801 = vst.msk [vmem:[%s2009_s26 + $0x4] sm:$0xf] %vm799_vm0, %v1482_v11  ;;  %817 = vst.msk [vmem:[%s2009_s26 + $0x44] sm:$0xf] %vm799_vm0, %v1498_v12  ;;  %v1514_v15 = vpack.c.bf16 %v518_v13, %v518_v13  ;;  %v1530_v16 = vpack.c.bf16 %v598_v14, %v598_v14  ;;  %866 = vrot.lane.b32.xlu1 %v1498_v12, %s1792_s30  ;;  %864 = vrot.lane.b32.xlu0 %v1497_v4, %s1792_s30 }
 0x120   : > { %v522_v17 = vpop.f32.mrf.mxu0  ;;  %v602_v18 = vpop.f32.mrf.mxu1 }
 0x121   : > { %1089 = vst.msk [vmem:[%s2015_s27 + $0x4] sm:$0xf] %vm799_vm0, %v1514_v15  ;;  %1105 = vst.msk [vmem:[%s2015_s27 + $0x44] sm:$0xf] %vm799_vm0, %v1530_v16  ;;  %v1483_v19 = vpack.c.bf16 %v522_v17, %v522_v17  ;;  %v1499_v20 = vpack.c.bf16 %v602_v18, %v602_v18 }
 0x122   : > { %v524_v21 = vpop.f32.mrf.mxu0  ;;  %v604_v22 = vpop.f32.mrf.mxu1 }
 0x123   : > { %802 = vst.msk [vmem:[%s2009_s26 + $0x8] sm:$0xf] %vm799_vm0, %v1483_v19  ;;  %818 = vst.msk [vmem:[%s2009_s26 + $0x48] sm:$0xf] %vm799_vm0, %v1499_v20  ;;  %v1515_v23 = vpack.c.bf16 %v524_v21, %v524_v21  ;;  %v1531_v24 = vpack.c.bf16 %v604_v22, %v604_v22  ;;  %834 = vrot.lane.b32.xlu0 %v1482_v11, %s1792_s30  ;;  %836 = vrot.lane.b32.xlu1 %v1483_v19, %s1792_s30 }
 0x124   : > { %v526_v25 = vpop.f32.mrf.mxu0  ;;  %v606_v26 = vpop.f32.mrf.mxu1 }
 0x125   : > { %1090 = vst.msk [vmem:[%s2015_s27 + $0x8] sm:$0xf] %vm799_vm0, %v1515_v23  ;;  %1106 = vst.msk [vmem:[%s2015_s27 + $0x48] sm:$0xf] %vm799_vm0, %v1531_v24  ;;  %v1484_v27 = vpack.c.bf16 %v526_v25, %v526_v25  ;;  %v1500_v28 = vpack.c.bf16 %v606_v26, %v606_v26 }
 0x126   : > { %v528_v29 = vpop.f32.mrf.mxu0  ;;  %v608_v30 = vpop.f32.mrf.mxu1 }
 0x127   : > { %803 = vst.msk [vmem:[%s2009_s26 + $0xc] sm:$0xf] %vm799_vm0, %v1484_v27  ;;  %819 = vst.msk [vmem:[%s2009_s26 + $0x4c] sm:$0xf] %vm799_vm0, %v1500_v28  ;;  %v1516_v31 = vpack.c.bf16 %v528_v29, %v528_v29  ;;  %v1532_v32 = vpack.c.bf16 %v608_v30, %v608_v30  ;;  %868 = vrot.lane.b32.xlu0 %v1499_v20, %s1792_s30  ;;  %838 = vrot.lane.b32.xlu1 %v1484_v27, %s1792_s30 }
 0x128   : > { %v532_v33 = vpop.f32.mrf.mxu0  ;;  %v612_v34 = vpop.f32.mrf.mxu1 }
 0x129   : > { %1091 = vst.msk [vmem:[%s2015_s27 + $0xc] sm:$0xf] %vm799_vm0, %v1516_v31  ;;  %1107 = vst.msk [vmem:[%s2015_s27 + $0x4c] sm:$0xf] %vm799_vm0, %v1532_v32  ;;  %v1485_v35 = vpack.c.bf16 %v532_v33, %v532_v33  ;;  %v1501_v36 = vpack.c.bf16 %v612_v34, %v612_v34 }
 0x12a   : > { %v534_v37 = vpop.f32.mrf.mxu0  ;;  %v614_v38 = vpop.f32.mrf.mxu1 }
 0x12b   : > { %804 = vst.msk [vmem:[%s2009_s26 + $0x10] sm:$0xf] %vm799_vm0, %v1485_v35  ;;  %820 = vst.msk [vmem:[%s2009_s26 + $0x50] sm:$0xf] %vm799_vm0, %v1501_v36  ;;  %v1517_v39 = vpack.c.bf16 %v534_v37, %v534_v37  ;;  %v1533_v40 = vpack.c.bf16 %v614_v38, %v614_v38  ;;  %870 = vrot.lane.b32.xlu1 %v1500_v28, %s1792_s30  ;;  %840 = vrot.lane.b32.xlu0 %v1485_v35, %s1792_s30 }
 0x12c   : > { %v536_v41 = vpop.f32.mrf.mxu0  ;;  %v616_v42 = vpop.f32.mrf.mxu1 }
 0x12d   : > { %1092 = vst.msk [vmem:[%s2015_s27 + $0x10] sm:$0xf] %vm799_vm0, %v1517_v39  ;;  %1108 = vst.msk [vmem:[%s2015_s27 + $0x50] sm:$0xf] %vm799_vm0, %v1533_v40  ;;  %v1486_v43 = vpack.c.bf16 %v536_v41, %v536_v41  ;;  %v1502_v44 = vpack.c.bf16 %v616_v42, %v616_v42 }
 0x12e   : > { %v538_v45 = vpop.f32.mrf.mxu0  ;;  %v618_v46 = vpop.f32.mrf.mxu1 }
 0x12f   : > { %805 = vst.msk [vmem:[%s2009_s26 + $0x14] sm:$0xf] %vm799_vm0, %v1486_v43  ;;  %821 = vst.msk [vmem:[%s2009_s26 + $0x54] sm:$0xf] %vm799_vm0, %v1502_v44  ;;  %v1518_v47 = vpack.c.bf16 %v538_v45, %v538_v45  ;;  %v1534_v48 = vpack.c.bf16 %v618_v46, %v618_v46  ;;  %872 = vrot.lane.b32.xlu0 %v1501_v36, %s1792_s30  ;;  %842 = vrot.lane.b32.xlu1 %v1486_v43, %s1792_s30 }
 0x130   : > { %v542_v49 = vpop.f32.mrf.mxu0  ;;  %v622_v50 = vpop.f32.mrf.mxu1 }
 0x131   : > { %1093 = vst.msk [vmem:[%s2015_s27 + $0x14] sm:$0xf] %vm799_vm0, %v1518_v47  ;;  %1109 = vst.msk [vmem:[%s2015_s27 + $0x54] sm:$0xf] %vm799_vm0, %v1534_v48  ;;  %v1487_v51 = vpack.c.bf16 %v542_v49, %v542_v49  ;;  %v1503_v52 = vpack.c.bf16 %v622_v50, %v622_v50 }
 0x132   : > { %v544_v53 = vpop.f32.mrf.mxu0  ;;  %v624_v54 = vpop.f32.mrf.mxu1 }
 0x133   : > { %806 = vst.msk [vmem:[%s2009_s26 + $0x18] sm:$0xf] %vm799_vm0, %v1487_v51  ;;  %822 = vst.msk [vmem:[%s2009_s26 + $0x58] sm:$0xf] %vm799_vm0, %v1503_v52  ;;  %v1519_v55 = vpack.c.bf16 %v544_v53, %v544_v53  ;;  %v1535_v56 = vpack.c.bf16 %v624_v54, %v624_v54  ;;  %874 = vrot.lane.b32.xlu1 %v1502_v44, %s1792_s30  ;;  %844 = vrot.lane.b32.xlu0 %v1487_v51, %s1792_s30 }
 0x134   : > { %v546_v57 = vpop.f32.mrf.mxu0  ;;  %v626_v58 = vpop.f32.mrf.mxu1 }
 0x135   : > { %1094 = vst.msk [vmem:[%s2015_s27 + $0x18] sm:$0xf] %vm799_vm0, %v1519_v55  ;;  %1110 = vst.msk [vmem:[%s2015_s27 + $0x58] sm:$0xf] %vm799_vm0, %v1535_v56  ;;  %v1488_v59 = vpack.c.bf16 %v546_v57, %v546_v57  ;;  %v1504_v60 = vpack.c.bf16 %v626_v58, %v626_v58 }
 0x136   : > { %v548_v61 = vpop.f32.mrf.mxu0  ;;  %v628_v62 = vpop.f32.mrf.mxu1 }
 0x137   : > { %807 = vst.msk [vmem:[%s2009_s26 + $0x1c] sm:$0xf] %vm799_vm0, %v1488_v59  ;;  %823 = vst.msk [vmem:[%s2009_s26 + $0x5c] sm:$0xf] %vm799_vm0, %v1504_v60  ;;  %v1520_v63 = vpack.c.bf16 %v548_v61, %v548_v61  ;;  %v1536_v1 = vpack.c.bf16 %v628_v62, %v628_v62  ;;  %876 = vrot.lane.b32.xlu0 %v1503_v52, %s1792_s30  ;;  %846 = vrot.lane.b32.xlu1 %v1488_v59, %s1792_s30 }
 0x138   : > { %v552_v0 = vpop.f32.mrf.mxu0  ;;  %v632_v2 = vpop.f32.mrf.mxu1 }
 0x139   : > { %1095 = vst.msk [vmem:[%s2015_s27 + $0x1c] sm:$0xf] %vm799_vm0, %v1520_v63  ;;  %1111 = vst.msk [vmem:[%s2015_s27 + $0x5c] sm:$0xf] %vm799_vm0, %v1536_v1  ;;  %v1489_v3 = vpack.c.bf16 %v552_v0, %v552_v0  ;;  %v1505_v4 = vpack.c.bf16 %v632_v2, %v632_v2 }
 0x13a   : > { %v554_v5 = vpop.f32.mrf.mxu0  ;;  %v634_v6 = vpop.f32.mrf.mxu1 }
 0x13b   : > { %808 = vst.msk [vmem:[%s2009_s26 + $0x20] sm:$0xf] %vm799_vm0, %v1489_v3  ;;  %824 = vst.msk [vmem:[%s2009_s26 + $0x60] sm:$0xf] %vm799_vm0, %v1505_v4  ;;  %v1521_v7 = vpack.c.bf16 %v554_v5, %v554_v5  ;;  %v1537_v8 = vpack.c.bf16 %v634_v6, %v634_v6  ;;  %878 = vrot.lane.b32.xlu1 %v1504_v60, %s1792_s30  ;;  %848 = vrot.lane.b32.xlu0 %v1489_v3, %s1792_s30 }
 0x13c   : > { %v556_v9 = vpop.f32.mrf.mxu0  ;;  %v636_v10 = vpop.f32.mrf.mxu1 }
 0x13d   : > { %1096 = vst.msk [vmem:[%s2015_s27 + $0x20] sm:$0xf] %vm799_vm0, %v1521_v7  ;;  %1112 = vst.msk [vmem:[%s2015_s27 + $0x60] sm:$0xf] %vm799_vm0, %v1537_v8  ;;  %v1490_v11 = vpack.c.bf16 %v556_v9, %v556_v9  ;;  %v1506_v12 = vpack.c.bf16 %v636_v10, %v636_v10 }
 0x13e   : > { %v558_v13 = vpop.f32.mrf.mxu0  ;;  %v638_v14 = vpop.f32.mrf.mxu1 }
 0x13f   : > { %809 = vst.msk [vmem:[%s2009_s26 + $0x24] sm:$0xf] %vm799_vm0, %v1490_v11  ;;  %825 = vst.msk [vmem:[%s2009_s26 + $0x64] sm:$0xf] %vm799_vm0, %v1506_v12  ;;  %v1522_v15 = vpack.c.bf16 %v558_v13, %v558_v13  ;;  %v1538_v16 = vpack.c.bf16 %v638_v14, %v638_v14  ;;  %880 = vrot.lane.b32.xlu0 %v1505_v4, %s1792_s30  ;;  %850 = vrot.lane.b32.xlu1 %v1490_v11, %s1792_s30 }
 0x140   : > { %v562_v17 = vpop.f32.mrf.mxu0  ;;  %v642_v18 = vpop.f32.mrf.mxu1 }
 0x141   : > { %1097 = vst.msk [vmem:[%s2015_s27 + $0x24] sm:$0xf] %vm799_vm0, %v1522_v15  ;;  %1113 = vst.msk [vmem:[%s2015_s27 + $0x64] sm:$0xf] %vm799_vm0, %v1538_v16  ;;  %v1491_v19 = vpack.c.bf16 %v562_v17, %v562_v17  ;;  %v1507_v20 = vpack.c.bf16 %v642_v18, %v642_v18 }
 0x142   : > { %v564_v21 = vpop.f32.mrf.mxu0  ;;  %v644_v22 = vpop.f32.mrf.mxu1 }
 0x143   : > { %810 = vst.msk [vmem:[%s2009_s26 + $0x28] sm:$0xf] %vm799_vm0, %v1491_v19  ;;  %826 = vst.msk [vmem:[%s2009_s26 + $0x68] sm:$0xf] %vm799_vm0, %v1507_v20  ;;  %v1523_v23 = vpack.c.bf16 %v564_v21, %v564_v21  ;;  %v1539_v24 = vpack.c.bf16 %v644_v22, %v644_v22  ;;  %882 = vrot.lane.b32.xlu1 %v1506_v12, %s1792_s30  ;;  %852 = vrot.lane.b32.xlu0 %v1491_v19, %s1792_s30 }
 0x144   : > { %v566_v25 = vpop.f32.mrf.mxu0  ;;  %v646_v26 = vpop.f32.mrf.mxu1 }
 0x145   : > { %1098 = vst.msk [vmem:[%s2015_s27 + $0x28] sm:$0xf] %vm799_vm0, %v1523_v23  ;;  %1114 = vst.msk [vmem:[%s2015_s27 + $0x68] sm:$0xf] %vm799_vm0, %v1539_v24  ;;  %v1492_v27 = vpack.c.bf16 %v566_v25, %v566_v25  ;;  %v1508_v28 = vpack.c.bf16 %v646_v26, %v646_v26 }
 0x146   : > { %v568_v29 = vpop.f32.mrf.mxu0  ;;  %v648_v30 = vpop.f32.mrf.mxu1 }
 0x147   : > { %811 = vst.msk [vmem:[%s2009_s26 + $0x2c] sm:$0xf] %vm799_vm0, %v1492_v27  ;;  %827 = vst.msk [vmem:[%s2009_s26 + $0x6c] sm:$0xf] %vm799_vm0, %v1508_v28  ;;  %v1524_v31 = vpack.c.bf16 %v568_v29, %v568_v29  ;;  %v1540_v32 = vpack.c.bf16 %v648_v30, %v648_v30  ;;  %884 = vrot.lane.b32.xlu0 %v1507_v20, %s1792_s30  ;;  %854 = vrot.lane.b32.xlu1 %v1492_v27, %s1792_s30 }
 0x148   : > { %v572_v33 = vpop.f32.mrf.mxu0  ;;  %v652_v34 = vpop.f32.mrf.mxu1 }
 0x149   : > { %1099 = vst.msk [vmem:[%s2015_s27 + $0x2c] sm:$0xf] %vm799_vm0, %v1524_v31  ;;  %1115 = vst.msk [vmem:[%s2015_s27 + $0x6c] sm:$0xf] %vm799_vm0, %v1540_v32  ;;  %v1493_v35 = vpack.c.bf16 %v572_v33, %v572_v33  ;;  %v1509_v36 = vpack.c.bf16 %v652_v34, %v652_v34 }
 0x14a   : > { %v574_v37 = vpop.f32.mrf.mxu0  ;;  %v654_v38 = vpop.f32.mrf.mxu1 }
 0x14b   : > { %812 = vst.msk [vmem:[%s2009_s26 + $0x30] sm:$0xf] %vm799_vm0, %v1493_v35  ;;  %828 = vst.msk [vmem:[%s2009_s26 + $0x70] sm:$0xf] %vm799_vm0, %v1509_v36  ;;  %v1525_v39 = vpack.c.bf16 %v574_v37, %v574_v37  ;;  %v1541_v40 = vpack.c.bf16 %v654_v38, %v654_v38  ;;  %886 = vrot.lane.b32.xlu1 %v1508_v28, %s1792_s30  ;;  %856 = vrot.lane.b32.xlu0 %v1493_v35, %s1792_s30 }
 0x14c   : > { %v576_v41 = vpop.f32.mrf.mxu0  ;;  %v656_v42 = vpop.f32.mrf.mxu1 }
 0x14d   : > { %1100 = vst.msk [vmem:[%s2015_s27 + $0x30] sm:$0xf] %vm799_vm0, %v1525_v39  ;;  %1116 = vst.msk [vmem:[%s2015_s27 + $0x70] sm:$0xf] %vm799_vm0, %v1541_v40  ;;  %v1494_v43 = vpack.c.bf16 %v576_v41, %v576_v41  ;;  %v1510_v44 = vpack.c.bf16 %v656_v42, %v656_v42 }
 0x14e   : > { %v578_v45 = vpop.f32.mrf.mxu0  ;;  %v658_v46 = vpop.f32.mrf.mxu1 }
 0x14f   : > { %813 = vst.msk [vmem:[%s2009_s26 + $0x34] sm:$0xf] %vm799_vm0, %v1494_v43  ;;  %829 = vst.msk [vmem:[%s2009_s26 + $0x74] sm:$0xf] %vm799_vm0, %v1510_v44  ;;  %v1526_v47 = vpack.c.bf16 %v578_v45, %v578_v45  ;;  %v1542_v48 = vpack.c.bf16 %v658_v46, %v658_v46  ;;  %888 = vrot.lane.b32.xlu0 %v1509_v36, %s1792_s30  ;;  %858 = vrot.lane.b32.xlu1 %v1494_v43, %s1792_s30 }
 0x150   : > { %v582_v49 = vpop.f32.mrf.mxu0  ;;  %v662_v50 = vpop.f32.mrf.mxu1 }
 0x151   : > { %1101 = vst.msk [vmem:[%s2015_s27 + $0x34] sm:$0xf] %vm799_vm0, %v1526_v47  ;;  %1117 = vst.msk [vmem:[%s2015_s27 + $0x74] sm:$0xf] %vm799_vm0, %v1542_v48  ;;  %v1495_v51 = vpack.c.bf16 %v582_v49, %v582_v49  ;;  %v1511_v52 = vpack.c.bf16 %v662_v50, %v662_v50 }
 0x152   : > { %v584_v53 = vpop.f32.mrf.mxu0  ;;  %v664_v54 = vpop.f32.mrf.mxu1 }
 0x153   : > { %814 = vst.msk [vmem:[%s2009_s26 + $0x38] sm:$0xf] %vm799_vm0, %v1495_v51  ;;  %830 = vst.msk [vmem:[%s2009_s26 + $0x78] sm:$0xf] %vm799_vm0, %v1511_v52  ;;  %v1527_v55 = vpack.c.bf16 %v584_v53, %v584_v53  ;;  %v1543_v56 = vpack.c.bf16 %v664_v54, %v664_v54  ;;  %890 = vrot.lane.b32.xlu1 %v1510_v44, %s1792_s30  ;;  %860 = vrot.lane.b32.xlu0 %v1495_v51, %s1792_s30 }
 0x154   : > { %v586_v57 = vpop.f32.mrf.mxu0  ;;  %v666_v58 = vpop.f32.mrf.mxu1 }
 0x155   : > { %1102 = vst.msk [vmem:[%s2015_s27 + $0x38] sm:$0xf] %vm799_vm0, %v1527_v55  ;;  %1118 = vst.msk [vmem:[%s2015_s27 + $0x78] sm:$0xf] %vm799_vm0, %v1543_v56  ;;  %v1496_v59 = vpack.c.bf16 %v586_v57, %v586_v57  ;;  %v1512_v60 = vpack.c.bf16 %v666_v58, %v666_v58 }
 0x156   : > { %v588_v61 = vpop.f32.mrf.mxu0  ;;  %v668_v62 = vpop.f32.mrf.mxu1 }
 0x157   : > { %815 = vst.msk [vmem:[%s2009_s26 + $0x3c] sm:$0xf] %vm799_vm0, %v1496_v59  ;;  %831 = vst.msk [vmem:[%s2009_s26 + $0x7c] sm:$0xf] %vm799_vm0, %v1512_v60  ;;  %v1528_v63 = vpack.c.bf16 %v588_v61, %v588_v61  ;;  %v1544_v1 = vpack.c.bf16 %v668_v62, %v668_v62  ;;  %892 = vrot.lane.b32.xlu0 %v1511_v52, %s1792_s30  ;;  %862 = vrot.lane.b32.xlu1 %v1496_v59, %s1792_s30 }
 0x159   : > { %1103 = vst.msk [vmem:[%s2015_s27 + $0x3c] sm:$0xf] %vm799_vm0, %v1528_v63  ;;  %1119 = vst.msk [vmem:[%s2015_s27 + $0x7c] sm:$0xf] %vm799_vm0, %v1544_v1 }
 0x15b   : > { %894 = vrot.lane.b32.xlu1 %v1512_v60, %s1792_s30 }
 0x18d   : > { %v833_v0 = vpop.permute.xlu0 %832 }
 0x18e   : > { %928 = vst.msk [vmem:[%s2181_s12] sm:$0xf] %vm799_vm0, %v833_v0 }
 0x191   : > { %v867_v2 = vpop.permute.xlu1 %866  ;;  %v865_v3 = vpop.permute.xlu0 %864 }
 0x192   : > { %945 = vst.msk [vmem:[%s2181_s12 + $0x44] sm:$0xf] %vm799_vm0, %v867_v2  ;;  %944 = vst.msk [vmem:[%s2181_s12 + $0x40] sm:$0xf] %vm799_vm0, %v865_v3 }
 0x195   : > { %v835_v4 = vpop.permute.xlu0 %834  ;;  %v837_v5 = vpop.permute.xlu1 %836 }
 0x196   : > { %929 = vst.msk [vmem:[%s2181_s12 + $0x4] sm:$0xf] %vm799_vm0, %v835_v4  ;;  %930 = vst.msk [vmem:[%s2181_s12 + $0x8] sm:$0xf] %vm799_vm0, %v837_v5 }
 0x199   : > { %v869_v6 = vpop.permute.xlu0 %868  ;;  %v839_v7 = vpop.permute.xlu1 %838 }
 0x19a   : > { %946 = vst.msk [vmem:[%s2181_s12 + $0x48] sm:$0xf] %vm799_vm0, %v869_v6  ;;  %931 = vst.msk [vmem:[%s2181_s12 + $0xc] sm:$0xf] %vm799_vm0, %v839_v7 }
 0x19d   : > { %v871_v8 = vpop.permute.xlu1 %870  ;;  %v841_v9 = vpop.permute.xlu0 %840 }
 0x19e   : > { %947 = vst.msk [vmem:[%s2181_s12 + $0x4c] sm:$0xf] %vm799_vm0, %v871_v8  ;;  %932 = vst.msk [vmem:[%s2181_s12 + $0x10] sm:$0xf] %vm799_vm0, %v841_v9 }
 0x1a1   : > { %v873_v10 = vpop.permute.xlu0 %872  ;;  %v843_v11 = vpop.permute.xlu1 %842 }
 0x1a2   : > { %948 = vst.msk [vmem:[%s2181_s12 + $0x50] sm:$0xf] %vm799_vm0, %v873_v10  ;;  %933 = vst.msk [vmem:[%s2181_s12 + $0x14] sm:$0xf] %vm799_vm0, %v843_v11 }
 0x1a5   : > { %v875_v12 = vpop.permute.xlu1 %874  ;;  %v845_v13 = vpop.permute.xlu0 %844 }
 0x1a6   : > { %949 = vst.msk [vmem:[%s2181_s12 + $0x54] sm:$0xf] %vm799_vm0, %v875_v12  ;;  %934 = vst.msk [vmem:[%s2181_s12 + $0x18] sm:$0xf] %vm799_vm0, %v845_v13 }
 0x1a9   : > { %v877_v14 = vpop.permute.xlu0 %876  ;;  %v847_v15 = vpop.permute.xlu1 %846 }
 0x1aa   : > { %950 = vst.msk [vmem:[%s2181_s12 + $0x58] sm:$0xf] %vm799_vm0, %v877_v14  ;;  %935 = vst.msk [vmem:[%s2181_s12 + $0x1c] sm:$0xf] %vm799_vm0, %v847_v15 }
 0x1ad   : > { %v879_v16 = vpop.permute.xlu1 %878  ;;  %v849_v17 = vpop.permute.xlu0 %848 }
 0x1ae   : > { %951 = vst.msk [vmem:[%s2181_s12 + $0x5c] sm:$0xf] %vm799_vm0, %v879_v16  ;;  %936 = vst.msk [vmem:[%s2181_s12 + $0x20] sm:$0xf] %vm799_vm0, %v849_v17 }
 0x1b1   : > { %v881_v18 = vpop.permute.xlu0 %880  ;;  %v851_v19 = vpop.permute.xlu1 %850 }
 0x1b2   : > { %952 = vst.msk [vmem:[%s2181_s12 + $0x60] sm:$0xf] %vm799_vm0, %v881_v18  ;;  %937 = vst.msk [vmem:[%s2181_s12 + $0x24] sm:$0xf] %vm799_vm0, %v851_v19 }
 0x1b5   : > { %v883_v20 = vpop.permute.xlu1 %882  ;;  %v853_v21 = vpop.permute.xlu0 %852 }
 0x1b6   : > { %953 = vst.msk [vmem:[%s2181_s12 + $0x64] sm:$0xf] %vm799_vm0, %v883_v20  ;;  %938 = vst.msk [vmem:[%s2181_s12 + $0x28] sm:$0xf] %vm799_vm0, %v853_v21 }
 0x1b9   : > { %v885_v22 = vpop.permute.xlu0 %884  ;;  %v855_v23 = vpop.permute.xlu1 %854 }
 0x1ba   : > { %954 = vst.msk [vmem:[%s2181_s12 + $0x68] sm:$0xf] %vm799_vm0, %v885_v22  ;;  %939 = vst.msk [vmem:[%s2181_s12 + $0x2c] sm:$0xf] %vm799_vm0, %v855_v23 }
 0x1bd   : > { %v887_v24 = vpop.permute.xlu1 %886  ;;  %v857_v25 = vpop.permute.xlu0 %856 }
 0x1be   : > { %955 = vst.msk [vmem:[%s2181_s12 + $0x6c] sm:$0xf] %vm799_vm0, %v887_v24  ;;  %940 = vst.msk [vmem:[%s2181_s12 + $0x30] sm:$0xf] %vm799_vm0, %v857_v25 }
 0x1c1   : > { %v889_v26 = vpop.permute.xlu0 %888  ;;  %v859_v27 = vpop.permute.xlu1 %858 }
 0x1c2   : > { %956 = vst.msk [vmem:[%s2181_s12 + $0x70] sm:$0xf] %vm799_vm0, %v889_v26  ;;  %941 = vst.msk [vmem:[%s2181_s12 + $0x34] sm:$0xf] %vm799_vm0, %v859_v27 }
 0x1c5   : > { %v891_v28 = vpop.permute.xlu1 %890  ;;  %v861_v29 = vpop.permute.xlu0 %860 }
 0x1c6   : > { %957 = vst.msk [vmem:[%s2181_s12 + $0x74] sm:$0xf] %vm799_vm0, %v891_v28  ;;  %942 = vst.msk [vmem:[%s2181_s12 + $0x38] sm:$0xf] %vm799_vm0, %v861_v29 }
 0x1c9   : > { %v893_v30 = vpop.permute.xlu0 %892  ;;  %v863_v31 = vpop.permute.xlu1 %862 }
 0x1ca   : > { %958 = vst.msk [vmem:[%s2181_s12 + $0x78] sm:$0xf] %vm799_vm0, %v893_v30  ;;  %943 = vst.msk [vmem:[%s2181_s12 + $0x3c] sm:$0xf] %vm799_vm0, %v863_v31 }
 0x1cd   : > { %v895_v32 = vpop.permute.xlu1 %894 }
 0x1ce   : > { %959 = vst.msk [vmem:[%s2181_s12 + $0x7c] sm:$0xf] %vm799_vm0, %v895_v32 }
 0x1cf PF: > { %s18_s24 = sadd.s32 1, %s1786_s24   ;;  %s2294_s18 = sld [smem:[#allocation5_spill]] }
 0x1d0   : > { %p15_p12 = scmp.ge.s32.totalorder %s18_s24, 10   ;;  %s2295_s21 = sld [smem:[#allocation6_spill]] }
 0x1d1   : > { %s2296_s3 = sld [smem:[#allocation7_spill]]  ;;  %s2297_s15 = smov %s1754_s16 }
 0x1d2   : > { %s2298_s16 = smov %s1758_s17  ;;  %s2299_s17 = smov %s1900_s25 }
 0x1d3   : > { %s2300_s19 = smov %s1778_s22  ;;  %s2301_s20 = smov %s1782_s23 }
 0x1d4   : > { %s2303_s23 = smov %s2313_s28  ;;  %17 = sbr.rel (!%p15_p12) target bundleno = 9 (0x9), region = 93 }
 0x1d7   : > { %s2302_s22 = smov %s2296_s3 }
 0x1d9   :  { %1224 = vsyncpa [#allocation3], 1 }
 0x1da   :  { %1226 = vsyncpa [#allocation3 + $0x1], 1 }

</bundles_post_ra>
